<compile_context>
chip_gen: v5e
topology: v5e:2x2
jax: 0.10.0
libtpu: 0.0.40
codegen_flags: <defaults>
</compile_context>

<pallas_src>
import functools

import jax
import jax.numpy as jnp
from jax.experimental import pallas as pl
from jax.experimental.pallas import tpu as pltpu

LANES = 128
SUBLANES = 8
MAX_TILE_ROWS = 4096   # 4096 x 128 x 4 B = 2 MiB f32 per input block


def _masked_sum_kernel(out_ref, mask_ref, sum_ref, *,
                       tile_rows, valid_rows_last, is_ragged):
    i = pl.program_id(0)
    last = pl.num_programs(0) - 1

    @pl.when(i == 0)
    def _():
        sum_ref[...] = jnp.zeros_like(sum_ref)

    def load_prod():
        return out_ref[...].astype(jnp.float32) * mask_ref[...].astype(jnp.float32)

    def reduced(prod):
        # (tile_rows,128) -> (tile_rows//8, 8, 128), sum over the leading axis:
        # pure vreg-wise VALU adds (no XLU), result is a single (8,128) vreg.
        return jnp.sum(prod.reshape(tile_rows // SUBLANES, SUBLANES, LANES), axis=0)

    if is_ragged:
        # Steady state: pure vld + vmul + vadd, no masking overhead.
        @pl.when(i < last)
        def _():
            sum_ref[...] += reduced(load_prod())

        # Boundary (partial) block only: rows >= valid_rows_last are out-of-range
        # garbage from the partial DMA; zero them with a NaN-safe select BEFORE
        # the in-tile reduce.
        @pl.when(i == last)
        def _():
            prod = load_prod()
            row_ids = jax.lax.broadcasted_iota(jnp.int32, (tile_rows, LANES), 0)
            prod = jnp.where(row_ids < valid_rows_last, prod, 0.0)
            sum_ref[...] += reduced(prod)
    else:
        sum_ref[...] += reduced(load_prod())


def masked_negative_loss(output, gt_mask):
    """JAX/Pallas equivalent of MaskedNegativeLoss.forward.

    Returns mean(output * gt_mask) over all elements as f32 (matches the PyTorch
    module, which divides by output.numel() and does not negate).  gt_mask may be
    any dtype (bool/int8/bf16/f32 ...); it is cast to f32 inside the kernel, so
    binary masks should be fed in a narrow dtype to reduce HBM traffic.
    """
    assert output.shape == gt_mask.shape, "equal shapes expected (no broadcasting)"
    n_elems = output.size

    flat_o = output.reshape(-1)
    flat_m = gt_mask.reshape(-1)

    # Rows handled by the Pallas kernel: largest multiple of 8 rows of 128 lanes.
    rows_main = (n_elems // (SUBLANES * LANES)) * SUBLANES
    n_main = rows_main * LANES

    # < 1024-element remainder: one tiny plain-JAX op (no full-array pad copy).
    if n_main != n_elems:
        tail_sum = jnp.sum(flat_o[n_main:].astype(jnp.float32)
                           * flat_m[n_main:].astype(jnp.float32))
    else:
        tail_sum = jnp.float32(0.0)

    if rows_main == 0:
        return (tail_sum / jnp.float32(n_elems)).astype(jnp.float32)

    o2d = flat_o[:n_main].reshape(rows_main, LANES)
    m2d = flat_m[:n_main].reshape(rows_main, LANES)

    tile_rows = min(rows_main, MAX_TILE_ROWS)          # always a multiple of 8
    tiles_total = pl.cdiv(rows_main, tile_rows)
    valid_rows_last = rows_main - (tiles_total - 1) * tile_rows
    is_ragged = valid_rows_last != tile_rows

    kernel = functools.partial(
        _masked_sum_kernel,
        tile_rows=tile_rows,
        valid_rows_last=valid_rows_last,
        is_ragged=is_ragged,
    )

    bytes_accessed = (int(o2d.size) * o2d.dtype.itemsize
                      + int(m2d.size) * m2d.dtype.itemsize
                      + SUBLANES * LANES * 4)

    partials = pl.pallas_call(
        kernel,
        out_shape=jax.ShapeDtypeStruct((SUBLANES, LANES), jnp.float32),
        grid_spec=pltpu.PrefetchScalarGridSpec(
            num_scalar_prefetch=0,
            grid=(tiles_total,),
            in_specs=[
                pl.BlockSpec((tile_rows, LANES), lambda i: (i, 0)),
                pl.BlockSpec((tile_rows, LANES), lambda i: (i, 0)),
            ],
            # Constant block index across the reduction axis -> output stays
            # resident in VMEM and acts as the (8,128) accumulator.
            out_specs=pl.BlockSpec((SUBLANES, LANES), lambda i: (0, 0)),
        ),
        compiler_params=pltpu.CompilerParams(
            dimension_semantics=("arbitrary",),
        ),
        cost_estimate=pl.CostEstimate(
            flops=2 * int(n_elems),
            transcendentals=0,
            bytes_accessed=int(bytes_accessed),
        ),
    )(o2d, m2d)

    total = jnp.sum(partials) + tail_sum   # 1024 elements; trivially cheap
    return (total / jnp.float32(n_elems)).astype(jnp.float32)


if __name__ == "__main__":
    key = jax.random.PRNGKey(0)
    k1, k2, k3, k4, k5, k6 = jax.random.split(key, 6)

    # Small NCHW-like shapes: batch=2, channels=4, spatial=16x16.
    x_shape = (2, 4, 16, 16)
    output = jax.random.normal(k1, x_shape, dtype=jnp.float32)
    gt_mask = (jax.random.uniform(k2, x_shape) > 0.5).astype(jnp.float32)

    loss = masked_negative_loss(output, gt_mask)
    jax.block_until_ready(loss)
    ref = jnp.mean(output * gt_mask)
    assert jnp.allclose(loss, ref, atol=1e-5, rtol=1e-4), (loss, ref)

    # Narrow-dtype mask path (HBM-traffic optimization for binary masks).
    loss_i8 = masked_negative_loss(output, gt_mask.astype(jnp.int8))
    jax.block_until_ready(loss_i8)
    assert jnp.allclose(loss_i8, ref, atol=1e-5, rtol=1e-4), (loss_i8, ref)

    # Medium input exercising the multi-tile / ragged-last-block path
    # (rows=4696 > 4096 -> grid (2,), last block has 600 valid rows).
    y_shape = (2, 4, 587, 128)
    output2 = jax.random.normal(k3, y_shape, dtype=jnp.float32)
    gt_mask2 = (jax.random.uniform(k4, y_shape) > 0.5).astype(jnp.float32)
    loss2 = masked_negative_loss(output2, gt_mask2)
    jax.block_until_ready(loss2)
    ref2 = jnp.mean(output2 * gt_mask2)
    assert jnp.allclose(loss2, ref2, atol=1e-5, rtol=1e-4), (loss2, ref2)

    # Lane-unaligned element count (1155 elements) exercising the tail path.
    z_shape = (3, 5, 7, 11)
    output3 = jax.random.normal(k5, z_shape, dtype=jnp.float32)
    gt_mask3 = (jax.random.uniform(k6, z_shape) > 0.5).astype(jnp.float32)
    loss3 = masked_negative_loss(output3, gt_mask3)
    jax.block_until_ready(loss3)
    ref3 = jnp.mean(output3 * gt_mask3)
    assert jnp.allclose(loss3, ref3, atol=1e-5, rtol=1e-4), (loss3, ref3)

    print("KERNEL_OK")
</pallas_src>

<mosaic_0001>
module attributes {stable_mosaic.version = 11 : i64} {
  func.func @_masked_sum_kernel(%arg0: i32, %arg1: memref<16x128xf32, #tpu.memory_space<vmem>>, %arg2: memref<16x128xf32, #tpu.memory_space<vmem>>, %arg3: memref<8x128xf32, #tpu.memory_space<vmem>>) attributes {dimension_semantics = [#tpu.dimension_semantics<arbitrary>], iteration_bounds = array<i64: 1>, scalar_prefetch = 0 : i64, scratch_operands = 0 : i64, tpu.core_type = #tpu.core_type<tc>, window_params = [{transform_indices = @transform_0, window_bounds = array<i64: 16, 128>}, {transform_indices = @transform_1, window_bounds = array<i64: 16, 128>}, {pipeline_mode = #tpu.pipeline_mode<synchronous>, transform_indices = @transform_2, window_bounds = array<i64: 8, 128>}]} {
    %c0_i32 = arith.constant 0 : i32
    %0 = arith.cmpi eq, %arg0, %c0_i32 : i32
    %1 = arith.extui %0 : i1 to i32
    %c0_i32_0 = arith.constant 0 : i32
    %2 = arith.cmpi ne, %1, %c0_i32_0 : i32
    scf.if %2 {
      %cst_8 = arith.constant 0.000000e+00 : f32
      %11 = vector.broadcast %cst_8 : f32 to vector<8x128xf32>
      %c0_9 = arith.constant 0 : index
      %c0_10 = arith.constant 0 : index
      %12 = vector.load %arg3[%c0_9, %c0_10] : memref<8x128xf32, #tpu.memory_space<vmem>>, vector<8x128xf32>
      tpu.vector_store %arg3[%c0_9, %c0_10], %11 {strides = array<i32>} : memref<8x128xf32, #tpu.memory_space<vmem>>, vector<8x128xf32>,
    } else {
    }
    %c0 = arith.constant 0 : index
    %c0_1 = arith.constant 0 : index
    %3 = vector.load %arg3[%c0, %c0_1] : memref<8x128xf32, #tpu.memory_space<vmem>>, vector<8x128xf32>
    %c0_2 = arith.constant 0 : index
    %c0_3 = arith.constant 0 : index
    %4 = vector.load %arg1[%c0_2, %c0_3] : memref<16x128xf32, #tpu.memory_space<vmem>>, vector<16x128xf32>
    %c0_4 = arith.constant 0 : index
    %c0_5 = arith.constant 0 : index
    %5 = vector.load %arg2[%c0_4, %c0_5] : memref<16x128xf32, #tpu.memory_space<vmem>>, vector<16x128xf32>
    %6 = arith.mulf %4, %5 : vector<16x128xf32>
    %7 = vector.shape_cast %6 : vector<16x128xf32> to vector<2x8x128xf32>
    %cst = arith.constant dense<0.000000e+00> : vector<8x128xf32>
    %8 = vector.multi_reduction <add>, %7, %cst [0] : vector<2x8x128xf32> to vector<8x128xf32>
    %9 = arith.addf %3, %8 : vector<8x128xf32>
    %c0_6 = arith.constant 0 : index
    %c0_7 = arith.constant 0 : index
    %10 = vector.load %arg3[%c0_6, %c0_7] : memref<8x128xf32, #tpu.memory_space<vmem>>, vector<8x128xf32>
    tpu.vector_store %arg3[%c0_6, %c0_7], %9 {strides = array<i32>} : memref<8x128xf32, #tpu.memory_space<vmem>>, vector<8x128xf32>,
    return
  }
  func.func @transform_0(%arg0: i32) -> (i32, i32) {
    %c0_i32 = arith.constant 0 : i32
    %c0_i32_0 = arith.constant 0 : i32
    return %arg0, %c0_i32 : i32, i32
  }
  func.func @transform_1(%arg0: i32) -> (i32, i32) {
    %c0_i32 = arith.constant 0 : i32
    %c0_i32_0 = arith.constant 0 : i32
    return %arg0, %c0_i32 : i32, i32
  }
  func.func @transform_2(%arg0: i32) -> (i32, i32) {
    %c0_i32 = arith.constant 0 : i32
    %c0_i32_0 = arith.constant 0 : i32
    %c0_i32_1 = arith.constant 0 : i32
    return %c0_i32, %c0_i32_0 : i32, i32
  }
}

</mosaic_0001>

<bundles_post_ra>
// kernel: tpu_custom_call.1
= control target key start
LH: loop header
LB: loop body
LE: loop exit
PB: predicated region body
PF: predicated region fallthrough
CT: control target
= control target key end

     0   :  { %7 = vsyncpa [#allocation3], 0  ;;  %s190_s0 = inlined_call_operand.hbm [shape: f32[16,128], index: 0, kind: input, shape index: {}]   ;;  %s191_s1 = inlined_call_operand.hbm [shape: f32[16,128], index: 1, kind: input, shape index: {}]   ;;  %s192_s2 = inlined_call_operand.hbm [shape: f32[8,128], index: 2, kind: output, shape index: {}]  }
   0x1   :  { %8 = vsyncpa [#allocation6], 0 }
   0x2   :  { %9 = vsyncpa [#allocation4], 0  ;;  %s14_s11 = sshll.u32 %s190_s0, 4  ;;  %s161_s12 = smov [#allocation2]   ;;  %s15_s11 = int_to_ptr.hbm [resolvable:$true] %s14_s11 }
   0x3   :  { %s16_s13 = sshll.u32 %s161_s12, 4  ;;  %s27_s16 = sshll.u32 %s191_s1, 4  ;;  %s17_s13 = int_to_ptr.vmem [resolvable:$true] %s16_s13  ;;  %s28_s16 = int_to_ptr.hbm [resolvable:$true] %s27_s16 }
   0x4   :  { %s162_s17 = smov 128   ;;  %s163_s18 = smov 8  }
   0x5   :  { %22 = dma.hbm_to_vmem [thread:$0]  %s15_s11, 256, %s17_s13, [#allocation3], %s162_s17, %s162_s17, %s163_s18  }
   0x6   :  { %s164_s19 = smov [#allocation5]  }
   0x7   :  { %s29_s20 = sshll.u32 %s164_s19, 4  ;;  %s30_s20 = int_to_ptr.vmem [resolvable:$true] %s29_s20 }
   0x8   :  { %35 = dma.hbm_to_vmem [thread:$0]  %s28_s16, 256, %s30_s20, [#allocation6], %s162_s17, %s162_s17, %s163_s18  }
   0x9   :  { %155 = dma.done.wait [#allocation3], 256  }
   0xa   :  { %156 = vsyncadd [#allocation3], 4294967040 }
   0xb   :  { %157 = dma.done.wait [#allocation6], 256  }
   0xc   :  { %158 = vsyncadd [#allocation6], 4294967040  ;;  %v50_v0 = vld [vmem:[#allocation2] sm:$0xff]  ;;  %v51_v1 = vld [vmem:[#allocation2 + $0x8] sm:$0xff]  ;;  %s165_s0 = smov [#allocation7]   ;;  %s66_s23 = sshll.u32 %s192_s2, 4  ;;  %s67_s23 = int_to_ptr.hbm [resolvable:$true] %s66_s23 }
   0xd   :  { %v52_v2 = vld [vmem:[#allocation5] sm:$0xff]  ;;  %v53_v3 = vld [vmem:[#allocation5 + $0x8] sm:$0xff]  ;;  %s64_s1 = sshll.u32 %s165_s0, 4  ;;  %s65_s1 = int_to_ptr.vmem [resolvable:$true] %s64_s1 }
   0xe   :  { %v54_v4 = vmul.f32 %v52_v2, %v50_v0  ;;  %v55_v5 = vmul.f32 %v53_v3, %v51_v1 }
  0x10   :  { %v56_v6 = vadd.f32 %v55_v5, %v54_v4 }
  0x12   :  { %58 = vst [vmem:[#allocation7] sm:$0xff] %v56_v6 }
  0x13   :  { %69 = dma.vmem_to_hbm [thread:$0]  %s65_s1, 128, %s67_s23, [#allocation4]  }
  0x14   :  { %159 = dma.done.wait [#allocation4], 128  }
  0x15   :  { %160 = vsyncadd [#allocation4], 4294967168 }
  0x16   :  { %74 = vsyncpa [#allocation3], 1 }
  0x17   :  { %75 = vsyncpa [#allocation6], 1 }
  0x18   :  { %76 = vsyncpa [#allocation4], 1 }

</bundles_post_ra>
